<compile_context>
chip_gen: v5e
topology: v5e:2x2
jax: 0.10.0
libtpu: 0.0.40
codegen_flags: <defaults>
</compile_context>

<pallas_src>
import functools

import jax
import jax.numpy as jnp
from jax.experimental import pallas as pl
from jax.experimental.pallas import tpu as pltpu

BN_EPS = 1e-5


def _round_up(x, m):
    return (x + m - 1) // m * m


def _conv_relu_stats_kernel(x_ref, w_ref, b_ref, mask_ref,
                            y_ref, sum_ref, ssq_ref, *, tap_offsets):
    """Pass 1: conv (sum of shifted-slice matmuls) + bias + ReLU + BN stats.

    x_ref:    (1, C_in, L)         padded, row-major-flattened input image
    w_ref:    (KH*KW, C_out, C_in) per-tap weight matrices
    b_ref:    (C_out, 1)           conv bias (f32)
    mask_ref: (1, M_lane)          1.0 at valid output positions, 0.0 at the
                                   garbage columns introduced by the W pad
    y_ref:    (1, C_out, M_lane)   pre-BN activation (f32), lane-dense
    sum_ref:  (C_out, 1)           global per-channel sum   (accumulator)
    ssq_ref:  (C_out, 1)           global per-channel sum^2 (accumulator)
    """
    _, c_out, _ = w_ref.shape
    m_lane = y_ref.shape[-1]

    # Zero the stat accumulators once; they stay resident across the grid.
    @pl.when(pl.program_id(0) == 0)
    def _():
        sum_ref[...] = jnp.zeros_like(sum_ref)
        ssq_ref[...] = jnp.zeros_like(ssq_ref)

    # Conv as a sum over KH*KW taps.  Each tap: (C_out, C_in) @ (C_in, M_lane)
    # on the MXU with f32 accumulation; the shifted slice is taken on-chip
    # (lane rotation), so the input is read from HBM exactly once.
    acc = jnp.zeros((c_out, m_lane), dtype=jnp.float32)
    for t, off in enumerate(tap_offsets):
        rhs = x_ref[0, :, pl.ds(off, m_lane)]              # (C_in, M_lane)
        acc = acc + jnp.dot(w_ref[t], rhs,
                            preferred_element_type=jnp.float32)

    # Bias + ReLU (ReLU before BN, matching the module's forward order).
    y = jnp.maximum(acc + b_ref[...], 0.0)                  # f32
    y_ref[0] = y.astype(y_ref.dtype)

    # Single-pass global statistics over valid positions only.
    ym = y * mask_ref[...]
    sum_ref[...] += jnp.sum(ym, axis=1, keepdims=True)
    ssq_ref[...] += jnp.sum(ym * y, axis=1, keepdims=True)


def _bn_apply_kernel(y_ref, scale_ref, shift_ref, o_ref):
    """Pass 2: fused BN affine, o = y * scale + shift (per channel)."""
    o_ref[0] = (y_ref[0] * scale_ref[...] + shift_ref[...]).astype(o_ref.dtype)


def basic_conv2d(x, weight, bias, bn_gamma, bn_beta, *, padding=1, stride=1,
                 compute_dtype=jnp.bfloat16):
    """x: (N, C_in, H, W) NCHW.  weight: (C_out, C_in, KH, KW).  Returns NCHW.

    compute_dtype: dtype of the MXU operands (bf16 recommended on v6e/v7x,
    float32 for bit-faithful f32 numerics).  Accumulation and all BN math are
    always f32.
    """
    assert stride == 1, "only stride=1 implemented"
    N, C_in, H, W = x.shape
    C_out, _, KH, KW = weight.shape

    H_pad, W_pad = H + 2 * padding, W + 2 * padding
    H_out = H_pad - KH + 1
    W_out = W_pad - KW + 1

    # The conv is evaluated on an (H_out x W_pad) flat grid; columns
    # j in [W_out, W_pad) are garbage (masked from the BN stats and sliced off
    # at the end).  Round the flat extent up to a lane multiple so every store
    # is a full 128-lane vst.
    M_grid = H_out * W_pad
    M_lane = _round_up(max(M_grid, 128), 128)
    max_off = (KH - 1) * W_pad + (KW - 1)
    L = _round_up(max_off + M_lane, 128)

    # ---- glue: pad + flatten (no im2col blow-up, no transposes) -------------
    x_pad = jnp.pad(x, ((0, 0), (0, 0), (padding, padding), (padding, padding)))
    x_flat = x_pad.reshape(N, C_in, H_pad * W_pad)
    x_flat = jnp.pad(x_flat, ((0, 0), (0, 0), (0, L - H_pad * W_pad)))
    x_flat = x_flat.astype(compute_dtype)

    # Per-tap weight matrices (KH*KW, C_out, C_in); tap t = kh*KW + kw.
    w_taps = jnp.transpose(weight, (2, 3, 0, 1)).reshape(KH * KW, C_out, C_in)
    w_taps = w_taps.astype(compute_dtype)
    b_col = bias.reshape(C_out, 1).astype(jnp.float32)

    # Validity mask for the flat output grid (built once, tiny).
    p = jnp.arange(M_lane)
    valid = (p < M_grid) & ((p % W_pad) < W_out)
    mask = valid.astype(jnp.float32).reshape(1, M_lane)

    tap_offsets = tuple(kh * W_pad + kw for kh in range(KH) for kw in range(KW))
    kernel1 = functools.partial(_conv_relu_stats_kernel,
                                tap_offsets=tap_offsets)

    # ---- pass 1: conv + bias + ReLU, accumulate global BN stats -------------
    y_flat, ch_sum, ch_ssq = pl.pallas_call(
        kernel1,
        grid=(N,),
        in_specs=[
            pl.BlockSpec((1, C_in, L), lambda n: (n, 0, 0)),
            pl.BlockSpec((KH * KW, C_out, C_in), lambda n: (0, 0, 0)),
            pl.BlockSpec((C_out, 1), lambda n: (0, 0)),
            pl.BlockSpec((1, M_lane), lambda n: (0, 0)),
        ],
        out_specs=(
            pl.BlockSpec((1, C_out, M_lane), lambda n: (n, 0, 0)),
            pl.BlockSpec((C_out, 1), lambda n: (0, 0)),
            pl.BlockSpec((C_out, 1), lambda n: (0, 0)),
        ),
        out_shape=(
            jax.ShapeDtypeStruct((N, C_out, M_lane), jnp.float32),
            jax.ShapeDtypeStruct((C_out, 1), jnp.float32),
            jax.ShapeDtypeStruct((C_out, 1), jnp.float32),
        ),
        compiler_params=pltpu.CompilerParams(
            dimension_semantics=("arbitrary",)),   # stat accumulators revisit
    )(x_flat, w_taps, b_col, mask)

    # ---- fused BN affine from the global stats (O(C_out) glue) --------------
    count = jnp.float32(N * H_out * W_out)
    mean = ch_sum / count
    var = jnp.maximum(ch_ssq / count - mean * mean, 0.0)   # biased variance
    inv_std = jax.lax.rsqrt(var + BN_EPS)
    scale = bn_gamma.reshape(C_out, 1).astype(jnp.float32) * inv_std
    shift = bn_beta.reshape(C_out, 1).astype(jnp.float32) - mean * scale

    # ---- pass 2: normalize (y*scale + shift), lane-dense writeback ----------
    out_flat = pl.pallas_call(
        _bn_apply_kernel,
        grid=(N,),
        in_specs=[
            pl.BlockSpec((1, C_out, M_lane), lambda n: (n, 0, 0)),
            pl.BlockSpec((C_out, 1), lambda n: (0, 0)),
            pl.BlockSpec((C_out, 1), lambda n: (0, 0)),
        ],
        out_specs=pl.BlockSpec((1, C_out, M_lane), lambda n: (n, 0, 0)),
        out_shape=jax.ShapeDtypeStruct((N, C_out, M_lane), x.dtype),
        compiler_params=pltpu.CompilerParams(
            dimension_semantics=("parallel",)),    # independent per image
    )(y_flat, scale, shift)

    # Already channel-major: just drop the W-pad garbage columns (no transpose).
    out = out_flat[:, :, :M_grid].reshape(N, C_out, H_out, W_pad)
    return out[:, :, :, :W_out]


def _reference(x, weight, bias, bn_gamma, bn_beta, padding=1):
    """Pure-JAX reference (conv -> relu -> train-mode batchnorm)."""
    y = jax.lax.conv_general_dilated(
        x, weight, window_strides=(1, 1),
        padding=[(padding, padding), (padding, padding)],
        dimension_numbers=("NCHW", "OIHW", "NCHW"),
    ) + bias.reshape(1, -1, 1, 1)
    y = jnp.maximum(y, 0.0)
    mean = jnp.mean(y, axis=(0, 2, 3), keepdims=True)
    var = jnp.mean((y - mean) ** 2, axis=(0, 2, 3), keepdims=True)
    return (y - mean) * jax.lax.rsqrt(var + BN_EPS) * bn_gamma.reshape(
        1, -1, 1, 1) + bn_beta.reshape(1, -1, 1, 1)


if __name__ == "__main__":
    # BasicConv2d(in_channels=4, out_channels=8, kernel_size=3, padding=1)
    N, C_in, H, W = 2, 4, 16, 16
    C_out, KH, KW = 8, 3, 3

    key = jax.random.PRNGKey(0)
    kx, kw_, kb = jax.random.split(key, 3)

    x = jax.random.normal(kx, (N, C_in, H, W), dtype=jnp.float32)
    fan_in = C_in * KH * KW
    weight = jax.random.normal(kw_, (C_out, C_in, KH, KW), dtype=jnp.float32) * (
        1.0 / jnp.sqrt(fan_in))
    bias = jax.random.normal(kb, (C_out,), dtype=jnp.float32) * 0.1
    bn_gamma = jnp.ones((C_out,), dtype=jnp.float32)   # BN default init
    bn_beta = jnp.zeros((C_out,), dtype=jnp.float32)

    # f32 operands: bit-faithful semantics check against the reference.
    out_f32 = jax.block_until_ready(
        basic_conv2d(x, weight, bias, bn_gamma, bn_beta, padding=1,
                     compute_dtype=jnp.float32))
    ref = _reference(x, weight, bias, bn_gamma, bn_beta, padding=1)
    assert out_f32.shape == (N, C_out, H, W), out_f32.shape
    err = float(jnp.max(jnp.abs(out_f32 - ref)))
    assert err < 1e-3, err

    # bf16 MXU operands (v6e/v7x fast path), f32 accumulation/BN.  Compare
    # against the reference fed the same bf16-rounded operands.
    out_bf16 = jax.block_until_ready(
        basic_conv2d(x, weight, bias, bn_gamma, bn_beta, padding=1,
                     compute_dtype=jnp.bfloat16))
    x_r = x.astype(jnp.bfloat16).astype(jnp.float32)
    w_r = weight.astype(jnp.bfloat16).astype(jnp.float32)
    ref_bf16 = _reference(x_r, w_r, bias, bn_gamma, bn_beta, padding=1)
    err_bf = float(jnp.max(jnp.abs(out_bf16 - ref_bf16)))
    assert err_bf < 5e-3, err_bf

    print("KERNEL_OK")
</pallas_src>

<mosaic_0001>
module attributes {stable_mosaic.version = 11 : i64} {
  func.func @_conv_relu_stats_kernel(%arg0: i32, %arg1: memref<1x4x512xf32, #tpu.memory_space<vmem>>, %arg2: memref<9x8x4xf32, #tpu.memory_space<vmem>>, %arg3: memref<8x1xf32, #tpu.memory_space<vmem>>, %arg4: memref<1x384xf32, #tpu.memory_space<vmem>>, %arg5: memref<1x8x384xf32, #tpu.memory_space<vmem>>, %arg6: memref<8x1xf32, #tpu.memory_space<vmem>>, %arg7: memref<8x1xf32, #tpu.memory_space<vmem>>) attributes {dimension_semantics = [#tpu.dimension_semantics<arbitrary>], iteration_bounds = array<i64: 2>, scalar_prefetch = 0 : i64, scratch_operands = 0 : i64, tpu.core_type = #tpu.core_type<tc>, window_params = [{transform_indices = @transform_0, window_bounds = array<i64: 1, 4, 512>}, {pipeline_mode = #tpu.pipeline_mode<synchronous>, transform_indices = @transform_1, window_bounds = array<i64: 9, 8, 4>}, {pipeline_mode = #tpu.pipeline_mode<synchronous>, transform_indices = @transform_2, window_bounds = array<i64: 8, 1>}, {pipeline_mode = #tpu.pipeline_mode<synchronous>, transform_indices = @transform_3, window_bounds = array<i64: 1, 384>}, {transform_indices = @transform_4, window_bounds = array<i64: 1, 8, 384>}, {pipeline_mode = #tpu.pipeline_mode<synchronous>, transform_indices = @transform_5, window_bounds = array<i64: 8, 1>}, {pipeline_mode = #tpu.pipeline_mode<synchronous>, transform_indices = @transform_6, window_bounds = array<i64: 8, 1>}]} {
    %c0_i32 = arith.constant 0 : i32
    %0 = arith.cmpi eq, %arg0, %c0_i32 : i32
    %1 = arith.extui %0 : i1 to i32
    %c0_i32_0 = arith.constant 0 : i32
    %2 = arith.cmpi ne, %1, %c0_i32_0 : i32
    scf.if %2 {
      %cst_67 = arith.constant 0.000000e+00 : f32
      %80 = vector.broadcast %cst_67 : f32 to vector<8x1xf32>
      %c0_68 = arith.constant 0 : index
      %c0_69 = arith.constant 0 : index
      %81 = vector.load %arg6[%c0_68, %c0_69] : memref<8x1xf32, #tpu.memory_space<vmem>>, vector<8x1xf32>
      tpu.vector_store %arg6[%c0_68, %c0_69], %80 {strides = array<i32>} : memref<8x1xf32, #tpu.memory_space<vmem>>, vector<8x1xf32>,
      %cst_70 = arith.constant 0.000000e+00 : f32
      %82 = vector.broadcast %cst_70 : f32 to vector<8x1xf32>
      %c0_71 = arith.constant 0 : index
      %c0_72 = arith.constant 0 : index
      %83 = vector.load %arg7[%c0_71, %c0_72] : memref<8x1xf32, #tpu.memory_space<vmem>>, vector<8x1xf32>
      tpu.vector_store %arg7[%c0_71, %c0_72], %82 {strides = array<i32>} : memref<8x1xf32, #tpu.memory_space<vmem>>, vector<8x1xf32>,
    } else {
    }
    %cst = arith.constant 0.000000e+00 : f32
    %3 = vector.broadcast %cst : f32 to vector<8x384xf32>
    %c0 = arith.constant 0 : index
    %c0_1 = arith.constant 0 : index
    %c0_2 = arith.constant 0 : index
    %4 = vector.load %arg1[%c0, %c0_1, %c0_2] : memref<1x4x512xf32, #tpu.memory_space<vmem>>, vector<1x4x384xf32>
    %5 = vector.shape_cast %4 : vector<1x4x384xf32> to vector<4x384xf32>
    %c0_3 = arith.constant 0 : index
    %c0_4 = arith.constant 0 : index
    %c0_5 = arith.constant 0 : index
    %6 = vector.load %arg2[%c0_3, %c0_4, %c0_5] : memref<9x8x4xf32, #tpu.memory_space<vmem>>, vector<1x8x4xf32>
    %7 = vector.shape_cast %6 : vector<1x8x4xf32> to vector<8x4xf32>
    %cst_6 = arith.constant dense<0.000000e+00> : vector<8x384xf32>
    %8 = tpu.matmul %7, %5, %cst_6 {dimension_numbers = #tpu.dot_dimension_numbers<[1], [0], [0], [1], [0, 0, 1, 1], [], []>} : vector<8x4xf32>, vector<4x384xf32>, vector<8x384xf32> -> vector<8x384xf32>
    %9 = arith.addf %3, %8 : vector<8x384xf32>
    %c0_7 = arith.constant 0 : index
    %c0_8 = arith.constant 0 : index
    %c1 = arith.constant 1 : index
    %10 = vector.load %arg1[%c0_7, %c0_8, %c1] : memref<1x4x512xf32, #tpu.memory_space<vmem>>, vector<1x4x384xf32>
    %11 = vector.shape_cast %10 : vector<1x4x384xf32> to vector<4x384xf32>
    %c1_9 = arith.constant 1 : index
    %c0_10 = arith.constant 0 : index
    %c0_11 = arith.constant 0 : index
    %12 = vector.load %arg2[%c1_9, %c0_10, %c0_11] : memref<9x8x4xf32, #tpu.memory_space<vmem>>, vector<1x8x4xf32>
    %13 = vector.shape_cast %12 : vector<1x8x4xf32> to vector<8x4xf32>
    %cst_12 = arith.constant dense<0.000000e+00> : vector<8x384xf32>
    %14 = tpu.matmul %13, %11, %cst_12 {dimension_numbers = #tpu.dot_dimension_numbers<[1], [0], [0], [1], [0, 0, 1, 1], [], []>} : vector<8x4xf32>, vector<4x384xf32>, vector<8x384xf32> -> vector<8x384xf32>
    %15 = arith.addf %9, %14 : vector<8x384xf32>
    %c0_13 = arith.constant 0 : index
    %c0_14 = arith.constant 0 : index
    %c2 = arith.constant 2 : index
    %16 = vector.load %arg1[%c0_13, %c0_14, %c2] : memref<1x4x512xf32, #tpu.memory_space<vmem>>, vector<1x4x384xf32>
    %17 = vector.shape_cast %16 : vector<1x4x384xf32> to vector<4x384xf32>
    %c2_15 = arith.constant 2 : index
    %c0_16 = arith.constant 0 : index
    %c0_17 = arith.constant 0 : index
    %18 = vector.load %arg2[%c2_15, %c0_16, %c0_17] : memref<9x8x4xf32, #tpu.memory_space<vmem>>, vector<1x8x4xf32>
    %19 = vector.shape_cast %18 : vector<1x8x4xf32> to vector<8x4xf32>
    %cst_18 = arith.constant dense<0.000000e+00> : vector<8x384xf32>
    %20 = tpu.matmul %19, %17, %cst_18 {dimension_numbers = #tpu.dot_dimension_numbers<[1], [0], [0], [1], [0, 0, 1, 1], [], []>} : vector<8x4xf32>, vector<4x384xf32>, vector<8x384xf32> -> vector<8x384xf32>
    %21 = arith.addf %15, %20 : vector<8x384xf32>
    %c0_19 = arith.constant 0 : index
    %c0_20 = arith.constant 0 : index
    %c18 = arith.constant 18 : index
    %22 = vector.load %arg1[%c0_19, %c0_20, %c18] : memref<1x4x512xf32, #tpu.memory_space<vmem>>, vector<1x4x384xf32>
    %23 = vector.shape_cast %22 : vector<1x4x384xf32> to vector<4x384xf32>
    %c3 = arith.constant 3 : index
    %c0_21 = arith.constant 0 : index
    %c0_22 = arith.constant 0 : index
    %24 = vector.load %arg2[%c3, %c0_21, %c0_22] : memref<9x8x4xf32, #tpu.memory_space<vmem>>, vector<1x8x4xf32>
    %25 = vector.shape_cast %24 : vector<1x8x4xf32> to vector<8x4xf32>
    %cst_23 = arith.constant dense<0.000000e+00> : vector<8x384xf32>
    %26 = tpu.matmul %25, %23, %cst_23 {dimension_numbers = #tpu.dot_dimension_numbers<[1], [0], [0], [1], [0, 0, 1, 1], [], []>} : vector<8x4xf32>, vector<4x384xf32>, vector<8x384xf32> -> vector<8x384xf32>
    %27 = arith.addf %21, %26 : vector<8x384xf32>
    %c0_24 = arith.constant 0 : index
    %c0_25 = arith.constant 0 : index
    %c19 = arith.constant 19 : index
    %28 = vector.load %arg1[%c0_24, %c0_25, %c19] : memref<1x4x512xf32, #tpu.memory_space<vmem>>, vector<1x4x384xf32>
    %29 = vector.shape_cast %28 : vector<1x4x384xf32> to vector<4x384xf32>
    %c4 = arith.constant 4 : index
    %c0_26 = arith.constant 0 : index
    %c0_27 = arith.constant 0 : index
    %30 = vector.load %arg2[%c4, %c0_26, %c0_27] : memref<9x8x4xf32, #tpu.memory_space<vmem>>, vector<1x8x4xf32>
    %31 = vector.shape_cast %30 : vector<1x8x4xf32> to vector<8x4xf32>
    %cst_28 = arith.constant dense<0.000000e+00> : vector<8x384xf32>
    %32 = tpu.matmul %31, %29, %cst_28 {dimension_numbers = #tpu.dot_dimension_numbers<[1], [0], [0], [1], [0, 0, 1, 1], [], []>} : vector<8x4xf32>, vector<4x384xf32>, vector<8x384xf32> -> vector<8x384xf32>
    %33 = arith.addf %27, %32 : vector<8x384xf32>
    %c0_29 = arith.constant 0 : index
    %c0_30 = arith.constant 0 : index
    %c20 = arith.constant 20 : index
    %34 = vector.load %arg1[%c0_29, %c0_30, %c20] : memref<1x4x512xf32, #tpu.memory_space<vmem>>, vector<1x4x384xf32>
    %35 = vector.shape_cast %34 : vector<1x4x384xf32> to vector<4x384xf32>
    %c5 = arith.constant 5 : index
    %c0_31 = arith.constant 0 : index
    %c0_32 = arith.constant 0 : index
    %36 = vector.load %arg2[%c5, %c0_31, %c0_32] : memref<9x8x4xf32, #tpu.memory_space<vmem>>, vector<1x8x4xf32>
    %37 = vector.shape_cast %36 : vector<1x8x4xf32> to vector<8x4xf32>
    %cst_33 = arith.constant dense<0.000000e+00> : vector<8x384xf32>
    %38 = tpu.matmul %37, %35, %cst_33 {dimension_numbers = #tpu.dot_dimension_numbers<[1], [0], [0], [1], [0, 0, 1, 1], [], []>} : vector<8x4xf32>, vector<4x384xf32>, vector<8x384xf32> -> vector<8x384xf32>
    %39 = arith.addf %33, %38 : vector<8x384xf32>
    %c0_34 = arith.constant 0 : index
    %c0_35 = arith.constant 0 : index
    %c36 = arith.constant 36 : index
    %40 = vector.load %arg1[%c0_34, %c0_35, %c36] : memref<1x4x512xf32, #tpu.memory_space<vmem>>, vector<1x4x384xf32>
    %41 = vector.shape_cast %40 : vector<1x4x384xf32> to vector<4x384xf32>
    %c6 = arith.constant 6 : index
    %c0_36 = arith.constant 0 : index
    %c0_37 = arith.constant 0 : index
    %42 = vector.load %arg2[%c6, %c0_36, %c0_37] : memref<9x8x4xf32, #tpu.memory_space<vmem>>, vector<1x8x4xf32>
    %43 = vector.shape_cast %42 : vector<1x8x4xf32> to vector<8x4xf32>
    %cst_38 = arith.constant dense<0.000000e+00> : vector<8x384xf32>
    %44 = tpu.matmul %43, %41, %cst_38 {dimension_numbers = #tpu.dot_dimension_numbers<[1], [0], [0], [1], [0, 0, 1, 1], [], []>} : vector<8x4xf32>, vector<4x384xf32>, vector<8x384xf32> -> vector<8x384xf32>
    %45 = arith.addf %39, %44 : vector<8x384xf32>
    %c0_39 = arith.constant 0 : index
    %c0_40 = arith.constant 0 : index
    %c37 = arith.constant 37 : index
    %46 = vector.load %arg1[%c0_39, %c0_40, %c37] : memref<1x4x512xf32, #tpu.memory_space<vmem>>, vector<1x4x384xf32>
    %47 = vector.shape_cast %46 : vector<1x4x384xf32> to vector<4x384xf32>
    %c7 = arith.constant 7 : index
    %c0_41 = arith.constant 0 : index
    %c0_42 = arith.constant 0 : index
    %48 = vector.load %arg2[%c7, %c0_41, %c0_42] : memref<9x8x4xf32, #tpu.memory_space<vmem>>, vector<1x8x4xf32>
    %49 = vector.shape_cast %48 : vector<1x8x4xf32> to vector<8x4xf32>
    %cst_43 = arith.constant dense<0.000000e+00> : vector<8x384xf32>
    %50 = tpu.matmul %49, %47, %cst_43 {dimension_numbers = #tpu.dot_dimension_numbers<[1], [0], [0], [1], [0, 0, 1, 1], [], []>} : vector<8x4xf32>, vector<4x384xf32>, vector<8x384xf32> -> vector<8x384xf32>
    %51 = arith.addf %45, %50 : vector<8x384xf32>
    %c0_44 = arith.constant 0 : index
    %c0_45 = arith.constant 0 : index
    %c38 = arith.constant 38 : index
    %52 = vector.load %arg1[%c0_44, %c0_45, %c38] : memref<1x4x512xf32, #tpu.memory_space<vmem>>, vector<1x4x384xf32>
    %53 = vector.shape_cast %52 : vector<1x4x384xf32> to vector<4x384xf32>
    %c8 = arith.constant 8 : index
    %c0_46 = arith.constant 0 : index
    %c0_47 = arith.constant 0 : index
    %54 = vector.load %arg2[%c8, %c0_46, %c0_47] : memref<9x8x4xf32, #tpu.memory_space<vmem>>, vector<1x8x4xf32>
    %55 = vector.shape_cast %54 : vector<1x8x4xf32> to vector<8x4xf32>
    %cst_48 = arith.constant dense<0.000000e+00> : vector<8x384xf32>
    %56 = tpu.matmul %55, %53, %cst_48 {dimension_numbers = #tpu.dot_dimension_numbers<[1], [0], [0], [1], [0, 0, 1, 1], [], []>} : vector<8x4xf32>, vector<4x384xf32>, vector<8x384xf32> -> vector<8x384xf32>
    %57 = arith.addf %51, %56 : vector<8x384xf32>
    %c0_49 = arith.constant 0 : index
    %c0_50 = arith.constant 0 : index
    %58 = vector.load %arg3[%c0_49, %c0_50] : memref<8x1xf32, #tpu.memory_space<vmem>>, vector<8x1xf32>
    %59 = vector.broadcast %58 : vector<8x1xf32> to vector<8x384xf32>
    %60 = arith.addf %57, %59 : vector<8x384xf32>
    %cst_51 = arith.constant 0.000000e+00 : f32
    %61 = vector.broadcast %cst_51 : f32 to vector<8x384xf32>
    %62 = arith.maximumf %60, %61 : vector<8x384xf32>
    %c0_52 = arith.constant 0 : index
    %c0_53 = arith.constant 0 : index
    %c0_54 = arith.constant 0 : index
    %63 = vector.load %arg5[%c0_52, %c0_53, %c0_54] : memref<1x8x384xf32, #tpu.memory_space<vmem>>, vector<1x8x384xf32>
    %64 = vector.shape_cast %63 : vector<1x8x384xf32> to vector<8x384xf32>
    %65 = vector.shape_cast %62 : vector<8x384xf32> to vector<1x8x384xf32>
    tpu.vector_store %arg5[%c0_52, %c0_53, %c0_54], %65 {strides = array<i32>} : memref<1x8x384xf32, #tpu.memory_space<vmem>>, vector<1x8x384xf32>,
    %c0_55 = arith.constant 0 : index
    %c0_56 = arith.constant 0 : index
    %66 = vector.load %arg4[%c0_55, %c0_56] : memref<1x384xf32, #tpu.memory_space<vmem>>, vector<1x384xf32>
    %67 = vector.broadcast %66 : vector<1x384xf32> to vector<8x384xf32>
    %68 = arith.mulf %62, %67 : vector<8x384xf32>
    %c0_57 = arith.constant 0 : index
    %c0_58 = arith.constant 0 : index
    %69 = vector.load %arg6[%c0_57, %c0_58] : memref<8x1xf32, #tpu.memory_space<vmem>>, vector<8x1xf32>
    %cst_59 = arith.constant dense<0.000000e+00> : vector<8xf32>
    %70 = vector.multi_reduction <add>, %68, %cst_59 [1] : vector<8x384xf32> to vector<8xf32>
    %71 = vector.shape_cast %70 : vector<8xf32> to vector<8x1xf32>
    %72 = arith.addf %69, %71 : vector<8x1xf32>
    %c0_60 = arith.constant 0 : index
    %c0_61 = arith.constant 0 : index
    %73 = vector.load %arg6[%c0_60, %c0_61] : memref<8x1xf32, #tpu.memory_space<vmem>>, vector<8x1xf32>
    tpu.vector_store %arg6[%c0_60, %c0_61], %72 {strides = array<i32>} : memref<8x1xf32, #tpu.memory_space<vmem>>, vector<8x1xf32>,
    %c0_62 = arith.constant 0 : index
    %c0_63 = arith.constant 0 : index
    %74 = vector.load %arg7[%c0_62, %c0_63] : memref<8x1xf32, #tpu.memory_space<vmem>>, vector<8x1xf32>
    %75 = arith.mulf %68, %62 : vector<8x384xf32>
    %cst_64 = arith.constant dense<0.000000e+00> : vector<8xf32>
    %76 = vector.multi_reduction <add>, %75, %cst_64 [1] : vector<8x384xf32> to vector<8xf32>
    %77 = vector.shape_cast %76 : vector<8xf32> to vector<8x1xf32>
    %78 = arith.addf %74, %77 : vector<8x1xf32>
    %c0_65 = arith.constant 0 : index
    %c0_66 = arith.constant 0 : index
    %79 = vector.load %arg7[%c0_65, %c0_66] : memref<8x1xf32, #tpu.memory_space<vmem>>, vector<8x1xf32>
    tpu.vector_store %arg7[%c0_65, %c0_66], %78 {strides = array<i32>} : memref<8x1xf32, #tpu.memory_space<vmem>>, vector<8x1xf32>,
    return
  }
  func.func @transform_0(%arg0: i32) -> (i32, i32, i32) {
    %c0_i32 = arith.constant 0 : i32
    %c0_i32_0 = arith.constant 0 : i32
    %c0_i32_1 = arith.constant 0 : i32
    return %arg0, %c0_i32, %c0_i32_0 : i32, i32, i32
  }
  func.func @transform_1(%arg0: i32) -> (i32, i32, i32) {
    %c0_i32 = arith.constant 0 : i32
    %c0_i32_0 = arith.constant 0 : i32
    %c0_i32_1 = arith.constant 0 : i32
    %c0_i32_2 = arith.constant 0 : i32
    return %c0_i32, %c0_i32_0, %c0_i32_1 : i32, i32, i32
  }
  func.func @transform_2(%arg0: i32) -> (i32, i32) {
    %c0_i32 = arith.constant 0 : i32
    %c0_i32_0 = arith.constant 0 : i32
    %c0_i32_1 = arith.constant 0 : i32
    return %c0_i32, %c0_i32_0 : i32, i32
  }
  func.func @transform_3(%arg0: i32) -> (i32, i32) {
    %c0_i32 = arith.constant 0 : i32
    %c0_i32_0 = arith.constant 0 : i32
    %c0_i32_1 = arith.constant 0 : i32
    return %c0_i32, %c0_i32_0 : i32, i32
  }
  func.func @transform_4(%arg0: i32) -> (i32, i32, i32) {
    %c0_i32 = arith.constant 0 : i32
    %c0_i32_0 = arith.constant 0 : i32
    %c0_i32_1 = arith.constant 0 : i32
    return %arg0, %c0_i32, %c0_i32_0 : i32, i32, i32
  }
  func.func @transform_5(%arg0: i32) -> (i32, i32) {
    %c0_i32 = arith.constant 0 : i32
    %c0_i32_0 = arith.constant 0 : i32
    %c0_i32_1 = arith.constant 0 : i32
    return %c0_i32, %c0_i32_0 : i32, i32
  }
  func.func @transform_6(%arg0: i32) -> (i32, i32) {
    %c0_i32 = arith.constant 0 : i32
    %c0_i32_0 = arith.constant 0 : i32
    %c0_i32_1 = arith.constant 0 : i32
    return %c0_i32, %c0_i32_0 : i32, i32
  }
}

</mosaic_0001>

<bundles_post_ra>
// kernel: tpu_custom_call.1
= control target key start
LH: loop header
LB: loop body
LE: loop exit
PB: predicated region body
PF: predicated region fallthrough
CT: control target
= control target key end

     0   :  { %12 = vsyncpa [#allocation3], 0  ;;  %s1720_s0 = inlined_call_operand.vmem [shape: f32[2,4,512], index: 0, kind: input, shape index: {}]   ;;  %s1721_s1 = inlined_call_operand.vmem [shape: f32[9,8,4], index: 1, kind: input, shape index: {}]   ;;  %s1722_s2 = inlined_call_operand.vmem [shape: f32[8,1], index: 2, kind: input, shape index: {}]   ;;  %s1723_s3 = inlined_call_operand.vmem [shape: f32[1,384], index: 3, kind: input, shape index: {}]   ;;  %s1724_s4 = inlined_call_operand.hbm [shape: f32[2,8,384], index: 4, kind: output, shape index: {0}]   ;;  %s1725_s5 = inlined_call_operand.vmem [shape: f32[8,1], index: 5, kind: output, shape index: {1}]   ;;  %s1726_s6 = inlined_call_operand.vmem [shape: f32[8,1], index: 6, kind: output, shape index: {2}]  }
   0x1   :  { %14 = vsyncpa [#allocation3 + $0x1], 0  ;;  %s1474_s21 = smov 0   ;;  %s1476_s22 = smov 0  }
   0x2   :  { %s1478_s23 = smov 0   ;;  %s1480_s24 = smov 0  }
   0x3 LB: > { %s1495_s25 = sadd.s32 4294967295, %s1427_s24   ;;  %s1239_s26 = sadd.s32 4294967294, %s1427_s24   ;;  %s1427_s24 = sphi %s1480_s24, %s1732_s24   ;;  %s1423_s23 = sphi %s1478_s23, %s1731_s23   ;;  %s1419_s22 = sphi %s1476_s22, %s1730_s22   ;;  %s1415_s21 = sphi %s1474_s21, %s1729_s21  }
   0x4   : > { %s1499_s27 = sadd.s32 1, %s1427_s24   ;;  %s116_s28 = sadd.s32 1, %s1423_s23 }
   0x5   : > { %s113_s29 = ssub.s32 %s1427_s24, %s1499_s27  ;;  %p126_p0 = scmp.ne.s32.totalorder %s1423_s23, %s1419_s22 }
   0x6   : > { %p114_p1 = scmp.eq.s32.totalorder %s113_s29, 0  ;;  %p127_p2 = scmp.eq.s32.totalorder %s1495_s25, 1 }
   0x7   : > { %p132_p3 = scmp.ne.s32.totalorder %s1419_s22, %s1415_s21  ;;  %p133_p4 = scmp.eq.s32.totalorder %s1239_s26, 1 }
   0x8   : > { %s1510_s30 = scalar_select %p114_p1, %s1423_s23, %s116_s28  }
   0x9   : > { %p1512_p5 = por %p127_p2, %p126_p0  ;;  %p1516_p6 = por %p133_p4, %p132_p3 }
   0xa   : > { %p1242_p7 = scmp.ge.s32.totalorder %s1427_s24, 1  ;;  %p210_p8 = scmp.lt.s32.totalorder %s1427_s24, 3 }
   0xc   : > { %p211_p9 = pnand %p1242_p7, %p210_p8 }
   0xd   : > { %s233_s9 = sand.u32 (!%p211_p9), 1, %s1419_s22   ;;  %p240_p10 = scmp.lt.s32.totalorder (!%p211_p9), %s1495_s25, 1 }
   0xe   : > { %214 = sbr.rel (%p211_p9) target bundleno = 503 (0x1f7), region = 36  ;;  %p1245_p11 = scmp.ne.s32.totalorder (!%p211_p9), %s1495_s25, 0 }
   0xf   : > { %s1312_s10 = smul.u32 (!%p211_p9), 24, %s233_s9 }
  0x11   : > { %s1530_s16 = scalar_lea.vmem (!%p211_p9), [#allocation2], %s1312_s10 }
  0x13   : > { %s241_s11 = scalar_select %p240_p10, %s1495_s25, 1 }
  0x14   : > { %248 = sbr.rel (%p1245_p11) target bundleno = 28 (0x1c), region = 40 }
  0x15   : > { %s1311_s12 = sshll.u32 %s241_s11, 4 }
  0x16   : > { %s244_s15 = scalar_lea.vmem %s1720_s0, %s1311_s12 }
  0x19   : > { %vm249_vm0 = vcmask 7168   ;;  %v1429_v0 = vmov 0.0  }
  0x1a   : > { %250 = vst.msk [vmem:[%s1725_s5] sm:$0xff] %vm249_vm0, %v1429_v0 }
  0x1b   : > { %251 = vst.msk [vmem:[%s1726_s6] sm:$0xff] %vm249_vm0, %v1429_v0 }
  0x1c PF: > { %v1539_v1 = vld [vmem:[%s244_s15 + $0x8] sm:$0xff]  ;;  %v1541_v2 = vld [vmem:[%s244_s15] sm:$0xff]  ;;  %s1430_s26 = smov 127   ;;  %s1431_s28 = smov 126   ;;  %vm284_vm1 = vcmask 1043456   ;;  %vm280_vm2 = vcmask 31744  }
  0x1d   : > { %263 = vst [vmem:[#allocation1 + $0x10] ss:$2 sm:$0xff] %v1539_v1  ;;  %v253_v3 = vld [vmem:[%s244_s15 + $0x8] sm:$0xf]  ;;  %s1432_s29 = smov 110   ;;  %s1433_s10 = smov 109  }
  0x1e   : > { %261 = vst [vmem:[#allocation1] ss:$2 sm:$0xff] %v1541_v2  ;;  %s1434_s11 = smov 108   ;;  %s1435_s12 = smov 92   ;;  %v254_v40 = vld [vmem:[%s1721_s1] sm:$0xff]  ;;  %vm276_vm3 = vcmask 1039360  }
  0x1f   : > { %s1436_s13 = smov 91   ;;  %s1437_s14 = smov 90   ;;  %vm449_vm4 = vcmask 1031168   ;;  %v1246_v51 = vld [vmem:[%s1721_s1 + $0x8] sm:$0xff]  ;;  %vm546_vm5 = vcmask 900096   ;;  %v1259_v55 = vld [vmem:[%s1721_s1 + $0x10] sm:$0xff] }
  0x20   : > { %v1266_v61 = vld [vmem:[%s1721_s1 + $0x18] sm:$0xff]  ;;  %vm643_vm6 = vcmask 891904   ;;  %vm740_vm7 = vcmask 883712   ;;  %vm837_vm8 = vcmask 752640   ;;  %vm934_vm9 = vcmask 744448   ;;  %s1165_s15 = sshll.u32 %s1530_s16, 4  ;;  %s1166_s15 = int_to_ptr.vmem [resolvable:$true] %s1165_s15 }
  0x21   : > { %vm1031_vm10 = vcmask 736256  }
  0x24   : > { %v266_v4 = vld.sshfl [vmem:[#allocation1 + $0x10] sm:$0xff pattern:$0x75316420]  ;;  %v267_v5 = vld.sshfl [vmem:[#allocation1 + $0x18] sm:$0xff pattern:$0x75316420] }
  0x25   : > { %272 = vrot.lane.b32.xlu0 %v266_v4, %s1430_s26  ;;  %v264_v6 = vld.sshfl [vmem:[#allocation1] sm:$0xff pattern:$0x75316420]  ;;  %355 = vst [vmem:[#allocation1 + $0x10] ss:$2 sm:$0xff] %v253_v3 }
  0x26   : > { %268 = vrot.lane.b32.xlu1 %v264_v6, %s1430_s26  ;;  %v265_v7 = vld.sshfl [vmem:[#allocation1 + $0x8] sm:$0xff pattern:$0x75316420]  ;;  %v1273_v4 = vld [vmem:[%s1721_s1 + $0x20] sm:$0xff] }
  0x27   : > { %353 = vst [vmem:[#allocation1] ss:$2 sm:$0xff] %v1541_v2 }
  0x2c   : > { %v1546_v8 = vld.sshfl [vmem:[#allocation1 + $0x10] sm:$0xff pattern:$0x75316420] }
  0x2d   : > { %274 = vrot.lane.b32.xlu0 %v267_v5, %s1430_s26  ;;  %436 = vst [vmem:[#allocation1 + $0x10] ss:$2 sm:$0xff] %v1539_v1 }
  0x2e   : > { %270 = vrot.lane.b32.xlu1 %v265_v7, %s1430_s26  ;;  %v1549_v9 = vld.sshfl [vmem:[#allocation1] sm:$0xff pattern:$0x75316420]  ;;  %v1551_v10 = vld.sshfl [vmem:[#allocation1 + $0x8] sm:$0xff pattern:$0x75316420] }
  0x2f   : > { %434 = vst [vmem:[#allocation1] ss:$2 sm:$0xff] %v1541_v2  ;;  %1253 = vmatpush.msk.msra.mxu3 %vm284_vm1, %v1549_v9 }
  0x30   : > { %1254 = vmatmul.msk.f32.vlgmr.msra.gmra.mxu3 %vm280_vm2, %v254_v40 }
  0x34   : > { %v439_v11 = vld.sshfl [vmem:[#allocation1 + $0x10] sm:$0xff pattern:$0x75316420]  ;;  %v440_v12 = vld.sshfl [vmem:[#allocation1 + $0x18] sm:$0xff pattern:$0x75316420] }
  0x35   : > { %445 = vrot.lane.b32.xlu0 %v439_v11, %s1431_s28  ;;  %533 = vst [vmem:[#allocation1 + $0x10] ss:$2 sm:$0xff] %v1539_v1 }
  0x36   : > { %v437_v13 = vld.sshfl [vmem:[#allocation1] sm:$0xff pattern:$0x75316420]  ;;  %v438_v14 = vld.sshfl [vmem:[#allocation1 + $0x8] sm:$0xff pattern:$0x75316420] }
  0x37   : > { %441 = vrot.lane.b32.xlu2 %v437_v13, %s1431_s28  ;;  %531 = vst [vmem:[#allocation1] ss:$2 sm:$0xff] %v1541_v2 }
  0x3c   : > { %v536_v15 = vld.sshfl [vmem:[#allocation1 + $0x10] sm:$0xff pattern:$0x75316420]  ;;  %v537_v16 = vld.sshfl [vmem:[#allocation1 + $0x18] sm:$0xff pattern:$0x75316420] }
  0x3d   : > { %447 = vrot.lane.b32.xlu0 %v440_v12, %s1431_s28  ;;  %630 = vst [vmem:[#allocation1 + $0x10] ss:$2 sm:$0xff] %v1539_v1  ;;  %v1280_v12 = vld [vmem:[%s1721_s1 + $0x28] sm:$0xff] }
  0x3e   : > { %v535_v17 = vld.sshfl [vmem:[#allocation1 + $0x8] sm:$0xff pattern:$0x75316420]  ;;  %v534_v18 = vld.sshfl [vmem:[#allocation1] sm:$0xff pattern:$0x75316420] }
  0x3f   : > { %540 = vrot.lane.b32.xlu1 %v535_v17, %s1432_s29  ;;  %443 = vrot.lane.b32.xlu2 %v438_v14, %s1431_s28  ;;  %628 = vst [vmem:[#allocation1] ss:$2 sm:$0xff] %v1541_v2  ;;  %s1385_s28 = scalar_lea.hbm %s1724_s4, 48 }
  0x44   : > { %v633_v19 = vld.sshfl [vmem:[#allocation1 + $0x10] sm:$0xff pattern:$0x75316420]  ;;  %v634_v20 = vld.sshfl [vmem:[#allocation1 + $0x18] sm:$0xff pattern:$0x75316420] }
  0x45   : > { %639 = vrot.lane.b32.xlu0 %v633_v19, %s1433_s10  ;;  %727 = vst [vmem:[#allocation1 + $0x10] ss:$2 sm:$0xff] %v1539_v1  ;;  %v1287_v19 = vld [vmem:[%s1721_s1 + $0x30] sm:$0xff] }
  0x46   : > { %v631_v21 = vld.sshfl [vmem:[#allocation1] sm:$0xff pattern:$0x75316420]  ;;  %v632_v22 = vld.sshfl [vmem:[#allocation1 + $0x8] sm:$0xff pattern:$0x75316420] }
  0x47   : > { %538 = vrot.lane.b32.xlu1 %v534_v18, %s1432_s29  ;;  %542 = vrot.lane.b32.xlu2 %v536_v15, %s1432_s29  ;;  %725 = vst [vmem:[#allocation1] ss:$2 sm:$0xff] %v1541_v2 }
  0x4c   : > { %v730_v23 = vld.sshfl [vmem:[#allocation1 + $0x10] sm:$0xff pattern:$0x75316420]  ;;  %v731_v24 = vld.sshfl [vmem:[#allocation1 + $0x18] sm:$0xff pattern:$0x75316420] }
  0x4d   : > { %637 = vrot.lane.b32.xlu0 %v632_v22, %s1433_s10  ;;  %824 = vst [vmem:[#allocation1 + $0x10] ss:$2 sm:$0xff] %v1539_v1 }
  0x4e   : > { %v728_v25 = vld.sshfl [vmem:[#allocation1] sm:$0xff pattern:$0x75316420]  ;;  %v729_v26 = vld.sshfl [vmem:[#allocation1 + $0x8] sm:$0xff pattern:$0x75316420] }
  0x4f   : > { %641 = vrot.lane.b32.xlu1 %v634_v20, %s1433_s10  ;;  %544 = vrot.lane.b32.xlu2 %v537_v16, %s1432_s29  ;;  %822 = vst [vmem:[#allocation1] ss:$2 sm:$0xff] %v1541_v2 }
  0x54   : > { %v827_v27 = vld.sshfl [vmem:[#allocation1 + $0x10] sm:$0xff pattern:$0x75316420]  ;;  %v828_v28 = vld.sshfl [vmem:[#allocation1 + $0x18] sm:$0xff pattern:$0x75316420] }
  0x55   : > { %738 = vrot.lane.b32.xlu0 %v731_v24, %s1434_s11  ;;  %921 = vst [vmem:[#allocation1 + $0x10] ss:$2 sm:$0xff] %v1539_v1  ;;  %v1107_v24 = vld [vmem:[%s1722_s2] sm:$0xff] }
  0x56   : > { %v826_v29 = vld.sshfl [vmem:[#allocation1 + $0x8] sm:$0xff pattern:$0x75316420]  ;;  %v825_v30 = vld.sshfl [vmem:[#allocation1] sm:$0xff pattern:$0x75316420] }
  0x57   : > { %732 = vrot.lane.b32.xlu1 %v728_v25, %s1434_s11  ;;  %635 = vrot.lane.b32.xlu2 %v631_v21, %s1433_s10  ;;  %919 = vst [vmem:[#allocation1] ss:$2 sm:$0xff] %v1541_v2  ;;  %v1294_v21 = vld [vmem:[%s1721_s1 + $0x38] sm:$0xff]  ;;  %v1438_v25 = vmov 0  }
  0x58   : > { %1363 = vset.pattern.permute.xlu2 %v1438_v25  ;;  %1364 = vset.pattern.permute.xlu0 %v1438_v25 }
  0x5c   : > { %v924_v31 = vld.sshfl [vmem:[#allocation1 + $0x10] sm:$0xff pattern:$0x75316420]  ;;  %v925_v32 = vld.sshfl [vmem:[#allocation1 + $0x18] sm:$0xff pattern:$0x75316420] }
  0x5d   : > { %829 = vrot.lane.b32.xlu0 %v825_v30, %s1435_s12  ;;  %1018 = vst [vmem:[#allocation1 + $0x10] ss:$2 sm:$0xff] %v1539_v1 }
  0x5e   : > { %v923_v33 = vld.sshfl [vmem:[#allocation1 + $0x8] sm:$0xff pattern:$0x75316420]  ;;  %v922_v34 = vld.sshfl [vmem:[#allocation1] sm:$0xff pattern:$0x75316420] }
  0x5f   : > { %831 = vrot.lane.b32.xlu1 %v826_v29, %s1435_s12  ;;  %734 = vrot.lane.b32.xlu2 %v729_v26, %s1434_s11  ;;  %1016 = vst [vmem:[#allocation1] ss:$2 sm:$0xff] %v1541_v2 }
  0x64   : > { %v1021_v36 = vld.sshfl [vmem:[#allocation1 + $0x10] sm:$0xff pattern:$0x75316420]  ;;  %v1022_v38 = vld.sshfl [vmem:[#allocation1 + $0x18] sm:$0xff pattern:$0x75316420] }
  0x65   : > { %930 = vrot.lane.b32.xlu0 %v924_v31, %s1436_s13 }
  0x66   : > { %v1019_v35 = vld.sshfl [vmem:[#allocation1] sm:$0xff pattern:$0x75316420]  ;;  %v1020_v37 = vld.sshfl [vmem:[#allocation1 + $0x8] sm:$0xff pattern:$0x75316420] }
  0x67   : > { %833 = vrot.lane.b32.xlu1 %v827_v27, %s1435_s12  ;;  %736 = vrot.lane.b32.xlu2 %v730_v23, %s1434_s11  ;;  %s1313_s11 = smul.u32 24, %s1495_s25  ;;  %s1152_s25 = scalar_lea.sflag [#allocation3], %s233_s9 }
  0x6d   : > { %932 = vrot.lane.b32.xlu0 %v925_v32, %s1436_s13 }
  0x6f   : > { %835 = vrot.lane.b32.xlu1 %v828_v28, %s1435_s12  ;;  %928 = vrot.lane.b32.xlu2 %v923_v33, %s1436_s13 }
  0x75   : > { %1023 = vrot.lane.b32.xlu0 %v1019_v35, %s1437_s14 }
  0x77   : > { %1027 = vrot.lane.b32.xlu1 %v1021_v36, %s1437_s14  ;;  %926 = vrot.lane.b32.xlu2 %v922_v34, %s1436_s13  ;;  %v1301_v36 = vld [vmem:[%s1721_s1 + $0x40] sm:$0xff] }
  0x7f   : > { %1025 = vrot.lane.b32.xlu1 %v1020_v37, %s1437_s14  ;;  %1029 = vrot.lane.b32.xlu2 %v1022_v38, %s1437_s14  ;;  %s1163_s14 = scalar_lea.hbm %s1724_s4, %s1313_s11 }
  0x80   : > { %s1167_s17 = sshll.u32 %s1163_s14, 4  ;;  %s1168_s17 = int_to_ptr.hbm [resolvable:$true] %s1167_s17 }
  0x81   : > { %s1379_s18 = sshra.s32 %s1168_s17, 4  ;;  %s1380_s18 = int_to_ptr.hbm [resolvable:$true] %s1379_s18 }
  0x82   : > { %s1381_s19 = scalar_lea.hbm %s1380_s18, 24  ;;  %p1386_p1 = scmp.lt.s32.totalorder %s1380_s18, %s1724_s4 }
  0x83   : > { %p1382_p12 = scmp.ne.s32.totalorder %s1380_s18, %s1381_s19  ;;  %p1387_p2 = scmp.lt.s32.totalorder %s1385_s28, %s1381_s19 }
  0x85   : > { %p1383_p13 = pnand %p1382_p12, %p1512_p5  ;;  %p1388_p3 = por %p1387_p2, %p1386_p1 }
  0x87   : > { %1110 = vperm.xlu2 %1363, %v1107_v24   ;;  %p1384_p0 = pneg %p1383_p13 }
  0x89   : > { %p1389_p4 = pnand %p1388_p3, %p1384_p0 }
  0x91   : > { %v442_v39 = vpop.permute.xlu2 %441 }
  0x97   : > { %v273_v41 = vpop.permute.xlu0 %272 }
  0x98   : > { %v269_v42 = vpop.permute.xlu1 %268 }
  0x99   : > { %v444_v43 = vpop.permute.xlu2 %443 }
  0x9a   : > { %v450_v47 = vsel %vm449_vm4, %v442_v39, %v444_v43 }
  0x9f   : > { %v275_v44 = vpop.permute.xlu0 %274 }
  0xa0   : > { %v271_v45 = vpop.permute.xlu1 %270  ;;  %v279_v46 = vsel %vm276_vm3, %v273_v41, %v275_v44 }
  0xa1   : > { %v277_v48 = vsel %vm276_vm3, %v269_v42, %v271_v45  ;;  %v278_v49 = vsel %vm276_vm3, %v271_v45, %v273_v41  ;;  %1251 = vmatpush.msk.msra.mxu2 %vm284_vm1, %v279_v46  ;;  %v543_v50 = vpop.permute.xlu2 %542 }
  0xa2   : > { %1247 = vmatpush.msk.msra.mxu0 %vm284_vm1, %v277_v48  ;;  %1249 = vmatpush.msk.msra.mxu1 %vm284_vm1, %v278_v49 }
  0xa3   : > { %1260 = vmatpush.msk.msrb.mxu2 %vm284_vm1, %v450_v47  ;;  %1248 = vmatmul.msk.f32.vlgmr.msra.gmra.mxu0 %vm280_vm2, %v1246_v51 }
  0xa4   : > { %1255 = vmatpush.msk.msrb.mxu0 %vm284_vm1, %v1551_v10  ;;  %1252 = vmatmul.msk.f32.vlgmr.msra.gmra.mxu2 %vm280_vm2, %v1246_v51 }
  0xa5   : > { %1250 = vmatmul.msk.f32.vlgmr.msra.gmra.mxu1 %vm280_vm2, %v1246_v51 }
  0xa6   : > { %1257 = vmatpush.msk.msrb.mxu1 %vm284_vm1, %v1546_v8 }
  0xa7   : > { %v446_v52 = vpop.permute.xlu0 %445 }
  0xa8   : > { %v451_v53 = vsel %vm449_vm4, %v444_v43, %v446_v52 }
  0xa9   : > { %1262 = vmatpush.msk.msrb.mxu3 %vm284_vm1, %v451_v53  ;;  %v545_v54 = vpop.permute.xlu2 %544 }
  0xaa   : > { %v549_v56 = vsel %vm546_vm5, %v543_v50, %v545_v54  ;;  %1263 = vmatmul.msk.f32.vlgmr.msrb.gmra.mxu3 %vm280_vm2, %v1259_v55 }
  0xab   : > { %1271 = vmatpush.msk.msra.mxu3 %vm284_vm1, %v549_v56  ;;  %1256 = vmatmul.msk.f32.vlgmr.msrb.gmra.mxu0 %vm280_vm2, %v254_v40 }
  0xac   : > { %1261 = vmatmul.msk.f32.vlgmr.msrb.gmra.mxu2 %vm280_vm2, %v1259_v55 }
  0xad   : > { %1258 = vmatmul.msk.f32.vlgmr.msrb.gmra.mxu1 %vm280_vm2, %v254_v40 }
  0xaf   : > { %v448_v57 = vpop.permute.xlu0 %447 }
  0xb0   : > { %v452_v58 = vsel %vm449_vm4, %v446_v52, %v448_v57 }
  0xb1   : > { %v541_v59 = vpop.permute.xlu1 %540  ;;  %1264 = vmatpush.msk.msra.mxu0 %vm284_vm1, %v452_v58  ;;  %v636_v60 = vpop.permute.xlu2 %635 }
  0xb2   : > { %v548_v62 = vsel %vm546_vm5, %v541_v59, %v543_v50  ;;  %1272 = vmatmul.msk.f32.vlgmr.msra.gmra.mxu3 %vm280_vm2, %v1266_v61 }
  0xb3   : > { %1269 = vmatpush.msk.msra.mxu2 %vm284_vm1, %v548_v62  ;;  %1265 = vmatmul.msk.f32.vlgmr.msra.gmra.mxu0 %vm280_vm2, %v1259_v55  ;;  %v385_v45 = vpop.f32.mrf.mxu3 }
  0xb4   : > { %1270 = vmatmul.msk.f32.vlgmr.msra.gmra.mxu2 %vm280_vm2, %v1266_v61 }
  0xb7   : > { %v640_v63 = vpop.permute.xlu0 %639 }
  0xb9   : > { %v539_v0 = vpop.permute.xlu1 %538  ;;  %v735_v1 = vpop.permute.xlu2 %734 }
  0xba   : > { %v547_v2 = vsel %vm546_vm5, %v539_v0, %v541_v59 }
  0xbb   : > { %1267 = vmatpush.msk.msra.mxu1 %vm284_vm1, %v547_v2 }
  0xbc   : > { %1268 = vmatmul.msk.f32.vlgmr.msra.gmra.mxu1 %vm280_vm2, %v1266_v61 }
  0xbf   : > { %v638_v3 = vpop.permute.xlu0 %637 }
  0xc0   : > { %v644_v5 = vsel %vm643_vm6, %v636_v60, %v638_v3  ;;  %v645_v6 = vsel %vm643_vm6, %v638_v3, %v640_v63 }
  0xc1   : > { %v642_v7 = vpop.permute.xlu1 %641  ;;  %1276 = vmatpush.msk.msrb.mxu1 %vm284_vm1, %v645_v6  ;;  %1274 = vmatpush.msk.msrb.mxu0 %vm284_vm1, %v644_v5  ;;  %v737_v8 = vpop.permute.xlu2 %736 }
  0xc2   : > { %v646_v9 = vsel %vm643_vm6, %v640_v63, %v642_v7  ;;  %v742_v10 = vsel %vm740_vm7, %v735_v1, %v737_v8  ;;  %1275 = vmatmul.msk.f32.vlgmr.msrb.gmra.mxu0 %vm280_vm2, %v1273_v4 }
  0xc3   : > { %1278 = vmatpush.msk.msrb.mxu2 %vm284_vm1, %v646_v9  ;;  %1283 = vmatpush.msk.msra.mxu0 %vm284_vm1, %v742_v10 }
  0xc4   : > { %1277 = vmatmul.msk.f32.vlgmr.msrb.gmra.mxu1 %vm280_vm2, %v1273_v4  ;;  %1279 = vmatmul.msk.f32.vlgmr.msrb.gmra.mxu2 %vm280_vm2, %v1273_v4 }
  0xc7   : > { %v739_v11 = vpop.permute.xlu0 %738 }
  0xc8   : > { %v743_v13 = vsel %vm740_vm7, %v737_v8, %v739_v11 }
  0xc9   : > { %v733_v14 = vpop.permute.xlu1 %732  ;;  %v929_v15 = vpop.permute.xlu2 %928  ;;  %1285 = vmatpush.msk.msra.mxu1 %vm284_vm1, %v743_v13 }
  0xca   : > { %v741_v16 = vsel %vm740_vm7, %v733_v14, %v735_v1  ;;  %1284 = vmatmul.msk.f32.vlgmr.msra.gmra.mxu0 %vm280_vm2, %v1280_v12 }
  0xcb   : > { %1281 = vmatpush.msk.msrb.mxu3 %vm284_vm1, %v741_v16 }
  0xcc   : > { %1282 = vmatmul.msk.f32.vlgmr.msrb.gmra.mxu3 %vm280_vm2, %v1280_v12  ;;  %1286 = vmatmul.msk.f32.vlgmr.msra.gmra.mxu1 %vm280_vm2, %v1280_v12 }
  0xcf   : > { %v830_v17 = vpop.permute.xlu0 %829 }
  0xd1   : > { %v832_v18 = vpop.permute.xlu1 %831  ;;  %v927_v20 = vpop.permute.xlu2 %926 }
  0xd2   : > { %v838_v22 = vsel %vm837_vm8, %v830_v17, %v832_v18  ;;  %v935_v23 = vsel %vm934_vm9, %v927_v20, %v929_v15 }
  0xd3   : > { %1288 = vmatpush.msk.msra.mxu2 %vm284_vm1, %v838_v22  ;;  %1295 = vmatpush.msk.msrb.mxu1 %vm284_vm1, %v935_v23 }
  0xd4   : > { %1289 = vmatmul.msk.f32.vlgmr.msra.gmra.mxu2 %vm280_vm2, %v1287_v19  ;;  %1296 = vmatmul.msk.f32.vlgmr.msrb.gmra.mxu1 %vm280_vm2, %v1294_v21 }
  0xd7   : > { %v931_v26 = vpop.permute.xlu0 %930 }
  0xd8   : > { %v936_v27 = vsel %vm934_vm9, %v929_v15, %v931_v26 }
  0xd9   : > { %v834_v28 = vpop.permute.xlu1 %833  ;;  %1297 = vmatpush.msk.msrb.mxu2 %vm284_vm1, %v936_v27  ;;  %v1030_v34 = vpop.permute.xlu2 %1029 }
  0xda   : > { %v839_v29 = vsel %vm837_vm8, %v832_v18, %v834_v28 }
  0xdb   : > { %1290 = vmatpush.msk.msra.mxu3 %vm284_vm1, %v839_v29 }
  0xdc   : > { %1291 = vmatmul.msk.f32.vlgmr.msra.gmra.mxu3 %vm280_vm2, %v1287_v19  ;;  %1298 = vmatmul.msk.f32.vlgmr.msrb.gmra.mxu2 %vm280_vm2, %v1294_v21 }
  0xdf   : > { %v933_v30 = vpop.permute.xlu0 %932 }
  0xe0   : > { %v937_v31 = vsel %vm934_vm9, %v931_v26, %v933_v30  ;;  %v1122_v26 = vld [vmem:[%s1723_s3] sm:$0x7] }
  0xe1   : > { %v836_v32 = vpop.permute.xlu1 %835  ;;  %1299 = vmatpush.msk.msrb.mxu3 %vm284_vm1, %v937_v31  ;;  %v1111_v22 = vpop.permute.xlu2 %1110 }
  0xe2   : > { %v840_v33 = vsel %vm837_vm8, %v834_v28, %v836_v32  ;;  %v1124_v32 = vperm.slane %v1122_v26, 0 }
  0xe3   : > { %1292 = vmatpush.msk.msrb.mxu0 %vm284_vm1, %v840_v33  ;;  %v1126_v33 = vperm.slane %v1122_v26, 2 }
  0xe4   : > { %1293 = vmatmul.msk.f32.vlgmr.msrb.gmra.mxu0 %vm280_vm2, %v1287_v19  ;;  %1300 = vmatmul.msk.f32.vlgmr.msrb.gmra.mxu3 %vm280_vm2, %v1294_v21 }
  0xe7   : > { %v1024_v38 = vpop.permute.xlu0 %1023 }
  0xe9   : > { %v1028_v35 = vpop.permute.xlu1 %1027 }
  0xea   : > { %v1034_v37 = vsel %vm1031_vm10, %v1028_v35, %v1030_v34 }
  0xeb   : > { %1306 = vmatpush.msk.msra.mxu2 %vm284_vm1, %v1034_v37  ;;  %v1125_v37 = vperm.slane %v1122_v26, 1 }
  0xec   : > { %1307 = vmatmul.msk.f32.vlgmr.msra.gmra.mxu2 %vm280_vm2, %v1301_v36 }
  0xf1   : > { %v1026_v39 = vpop.permute.xlu1 %1025 }
  0xf2   : > { %v1033_v40 = vsel %vm1031_vm10, %v1026_v39, %v1028_v35  ;;  %v1032_v41 = vsel %vm1031_vm10, %v1024_v38, %v1026_v39 }
  0xf3   : > { %1302 = vmatpush.msk.msra.mxu0 %vm284_vm1, %v1032_v41  ;;  %1304 = vmatpush.msk.msra.mxu1 %vm284_vm1, %v1033_v40 }
  0xf4   : > { %1303 = vmatmul.msk.f32.vlgmr.msra.gmra.mxu0 %vm280_vm2, %v1301_v36  ;;  %1305 = vmatmul.msk.f32.vlgmr.msra.gmra.mxu1 %vm280_vm2, %v1301_v36 }
 0x120   : > { %v308_v42 = vpop.f32.mrf.mxu0 }
 0x121   : > { %v386_v60 = vadd.f32 %v385_v45, %v308_v42 }
 0x122   : > { %v328_v43 = vpop.f32.mrf.mxu1 }
 0x127   : > { %v348_v44 = vpop.f32.mrf.mxu2 }
 0x128   : > { %v405_v46 = vpop.f32.mrf.mxu0 }
 0x129   : > { %v406_v58 = vadd.f32 %v405_v46, %v328_v43 }
 0x12a   : > { %v425_v47 = vpop.f32.mrf.mxu1 }
 0x12b   : > { %v426_v59 = vadd.f32 %v425_v47, %v348_v44 }
 0x12d   : > { %v499_v49 = vpop.f32.mrf.mxu3 }
 0x12e   : > { %v523_v61 = vadd.f32 %v499_v49, %v406_v58 }
 0x12f   : > { %v479_v48 = vpop.f32.mrf.mxu2 }
 0x130   : > { %v519_v50 = vpop.f32.mrf.mxu0  ;;  %v522_v0 = vadd.f32 %v479_v48, %v386_v60 }
 0x131   : > { %v524_v62 = vadd.f32 %v519_v50, %v426_v59 }
 0x135   : > { %v616_v53 = vpop.f32.mrf.mxu3 }
 0x136   : > { %v621_v5 = vadd.f32 %v616_v53, %v524_v62 }
 0x137   : > { %v596_v52 = vpop.f32.mrf.mxu2 }
 0x138   : > { %v620_v4 = vadd.f32 %v596_v52, %v523_v61 }
 0x139   : > { %v576_v51 = vpop.f32.mrf.mxu1 }
 0x13a   : > { %v619_v6 = vadd.f32 %v576_v51, %v522_v0 }
 0x13f   : > { %v673_v54 = vpop.f32.mrf.mxu0 }
 0x140   : > { %v716_v10 = vadd.f32 %v673_v54, %v619_v6 }
 0x141   : > { %v693_v55 = vpop.f32.mrf.mxu1 }
 0x142   : > { %v717_v7 = vadd.f32 %v693_v55, %v620_v4 }
 0x147   : > { %v713_v56 = vpop.f32.mrf.mxu2  ;;  %v790_v1 = vpop.f32.mrf.mxu0 }
 0x148   : > { %v718_v8 = vadd.f32 %v713_v56, %v621_v5  ;;  %v814_v14 = vadd.f32 %v790_v1, %v717_v7 }
 0x149   : > { %v810_v2 = vpop.f32.mrf.mxu1 }
 0x14a   : > { %v815_v15 = vadd.f32 %v810_v2, %v718_v8 }
 0x14f   : > { %v770_v57 = vpop.f32.mrf.mxu3 }
 0x150   : > { %v813_v13 = vadd.f32 %v770_v57, %v716_v10 }
 0x151   : > { %v964_v11 = vpop.f32.mrf.mxu1 }
 0x157   : > { %v867_v63 = vpop.f32.mrf.mxu2 }
 0x158   : > { %v910_v17 = vadd.f32 %v867_v63, %v813_v13 }
 0x15a   : > { %v1007_v23 = vadd.f32 %v964_v11, %v910_v17 }
 0x15f   : > { %v887_v3 = vpop.f32.mrf.mxu3  ;;  %v984_v9 = vpop.f32.mrf.mxu2 }
 0x160   : > { %v911_v18 = vadd.f32 %v887_v3, %v814_v14 }
 0x161   : > { %v907_v12 = vpop.f32.mrf.mxu0 }
 0x162   : > { %v912_v19 = vadd.f32 %v907_v12, %v815_v15  ;;  %v1008_v24 = vadd.f32 %v984_v9, %v911_v18 }
 0x167   : > { %v1004_v16 = vpop.f32.mrf.mxu3 }
 0x168   : > { %v1009_v20 = vadd.f32 %v1004_v16, %v912_v19 }
 0x16f   : > { %v1101_v21 = vpop.f32.mrf.mxu2 }
 0x170   : > { %v1106_v25 = vadd.f32 %v1101_v21, %v1009_v20 }
 0x171   : > { %v1061_v27 = vpop.f32.mrf.mxu0  ;;  %v1081_v28 = vpop.f32.mrf.mxu1 }
 0x172   : > { %v1115_v29 = vadd.f32 %v1111_v22, %v1106_v25  ;;  %v1104_v30 = vadd.f32 %v1061_v27, %v1007_v23  ;;  %v1105_v31 = vadd.f32 %v1081_v28, %v1008_v24 }
 0x174   : > { %v1118_v34 = vmax.f32 %v1115_v29, 0.0  ;;  %v1113_v35 = vadd.f32 %v1111_v22, %v1104_v30  ;;  %v1114_v36 = vadd.f32 %v1111_v22, %v1105_v31 }
 0x176   : > { %1121 = vst [vmem:[%s1530_s16 + $0x10] sm:$0xff] %v1118_v34  ;;  %v1116_v38 = vmax.f32 %v1113_v35, 0.0  ;;  %v1117_v39 = vmax.f32 %v1114_v36, 0.0  ;;  %v1132_v42 = vmul.f32 %v1126_v33, %v1118_v34 }
 0x178   : > { %1119 = vst [vmem:[%s1530_s16] sm:$0xff] %v1116_v38  ;;  %v1130_v40 = vmul.f32 %v1124_v32, %v1116_v38  ;;  %v1131_v41 = vmul.f32 %v1125_v37, %v1117_v39 }
 0x179   : > { %1120 = vst [vmem:[%s1530_s16 + $0x8] sm:$0xff] %v1117_v39 }
 0x17a   : > { %v1134_v43 = vadd.f32 %v1131_v41, %v1130_v40  ;;  %v1142_v44 = vmul.f32 %v1130_v40, %v1116_v38  ;;  %v1143_v45 = vmul.f32 %v1131_v41, %v1117_v39 }
 0x17b   : > { %1392 = shalt.err (!%p1389_p4)
}
 0x17c   : > { %1314 = dma.vmem_to_hbm [thread:$0]  (%p1512_p5), %s1166_s15, 384, %s1168_s17, %s1152_s25   ;;  %v1135_v46 = vadd.f32 %v1134_v43, %v1132_v42  ;;  %v1144_v47 = vmul.f32 %v1132_v42, %v1118_v34  ;;  %v1145_v48 = vadd.f32 %v1143_v45, %v1142_v44  ;;  %v1133_v50 = vld [vmem:[%s1725_s5] sm:$0xff]  ;;  %vm1139_vm11 = vcmask 7168  }
 0x17d   : > { %v1141_v52 = vld [vmem:[%s1726_s6] sm:$0xff] }
 0x17e   : > { %1136 = vadd.xlane.f32.xlu0 %v1135_v46  ;;  %v1146_v49 = vadd.f32 %v1145_v48, %v1144_v47 }
 0x180   : > { %1147 = vadd.xlane.f32.xlu1 %v1146_v49 }
 0x1f1   : > { %v1137_v51 = vpop.xlane.xlu0 %1136 }
 0x1f2   : > { %v1138_v53 = vadd.f32 %v1137_v51, %v1133_v50 }
 0x1f3   : > { %v1148_v54 = vpop.xlane.xlu1 %1147 }
 0x1f4   : > { %1140 = vst.msk [vmem:[%s1725_s5] sm:$0xff] %vm1139_vm11, %v1138_v53  ;;  %v1149_v55 = vadd.f32 %v1148_v54, %v1141_v52 }
 0x1f6   : > { %1150 = vst.msk [vmem:[%s1726_s6] sm:$0xff] %vm1139_vm11, %v1149_v55 }
 0x1f7 PF: > { %p1320_p5 = scmp.ge.s32.totalorder %s1427_s24, 2  ;;  %s1191_s17 = sand.u32 1, %s1415_s21  }
 0x1f8   : > { %s1192_s25 = scalar_lea.sflag [#allocation3], %s1191_s17 }
 0x1f9   : > { %p1317_p7 = pnand %p1320_p5, %p1516_p6 }
 0x1fb   : > { %p1318_p8 = pneg %p1317_p7 }
 0x1fd   : > { %1410 = dma.done.wait (%p1318_p8), %s1192_s25, 384  }
 0x1fe   : > { %1412 = vsyncadd (%p1318_p8), %s1192_s25, 4294966912  ;;  %p17_p9 = scmp.ge.s32.totalorder %s1499_s27, 4   ;;  %s1729_s21 = smov %s1419_s22 }
 0x1ff   : > { %s1730_s22 = smov %s1423_s23  ;;  %s1731_s23 = smov %s1510_s30 }
 0x200   : > { %s1732_s24 = smov %s1499_s27  ;;  %19 = sbr.rel (!%p17_p9) target bundleno = 3 (0x3), region = 108 }
 0x205   :  { %1198 = vsyncpa [#allocation3], 1 }
 0x206   :  { %1200 = vsyncpa [#allocation3 + $0x1], 1 }

</bundles_post_ra>
